<compile_context>
chip_gen: v5e
topology: v5e:2x2
jax: 0.10.0
libtpu: 0.0.40
codegen_flags: <defaults>
</compile_context>

<pallas_src>
import functools

import jax
import jax.numpy as jnp
from jax import lax
from jax.experimental import pallas as pl
from jax.experimental.pallas import tpu as pltpu

FOCUSING_PARAM = 2
BALANCE_PARAM = 0.25

# Per-row bytes: 2x double-buffered input tile + ~5 full-width f32 temporaries
# (f32 upcast, shifted, exp, iota, gather-select) + 512 B for the (TN,1) f32
# accumulator row (lane-padded to 128 in VMEM).
_N_F32_TEMPS = 5
_ACC_BYTES_PER_ROW = 512


def _round_down(x, m):
    return (x // m) * m


def _vmem_budgets():
    """(working-set budget bytes, vmem_limit_bytes), generation aware."""
    vmem_phys = None
    try:
        info = pltpu.get_tpu_info()
        vmem_phys = getattr(info, "vmem_capacity_bytes", None)
    except Exception:
        vmem_phys = None
    if vmem_phys is not None and vmem_phys >= (100 << 20):
        # v5e / v6e class: 128 MiB physical VMEM.
        return 64 << 20, 96 << 20
    # v7x class (64 MiB physical) or unknown: stay conservative.
    return 32 << 20, 48 << 20


def _partial_ce_kernel(logits_ref, tgt_ref, out_ref, acc_ref, *,
                       n_true, tile_rows, has_row_tail):
    """Accumulate per-row CE into acc_ref; reduce + emit on the last tile."""
    t = pl.program_id(0)

    @pl.when(t == 0)
    def _():
        acc_ref[...] = jnp.zeros_like(acc_ref)

    x = logits_ref[...]                                   # (TN, C), native dtype
    tn, c = x.shape
    tgt = tgt_ref[...]                                    # (TN, 1) int32

    # Numerically stable logsumexp over classes (lane axis), math in f32.
    xf = x.astype(jnp.float32)
    row_max = jnp.max(xf, axis=-1, keepdims=True)                       # (TN, 1)
    sum_exp = jnp.sum(jnp.exp(xf - row_max), axis=-1, keepdims=True)    # (TN, 1)
    lse = row_max + jnp.log(sum_exp)                                    # (TN, 1)

    # Gather the target logit via a masked lane-sum on the RAW tile (no one-hot
    # matmul; exact even in bf16 since only the target lane is non-zero).
    col_ids = lax.broadcasted_iota(jnp.int32, (tn, c), 1)
    tgt_logit = jnp.sum(jnp.where(col_ids == tgt, x, jnp.zeros_like(x)),
                        axis=-1, keepdims=True).astype(jnp.float32)     # (TN, 1)

    ce_rows = lse - tgt_logit                                           # (TN, 1)

    if has_row_tail:
        # Only the ragged tail tile has out-of-range (garbage) rows; zero them
        # with a true select so NaN/Inf garbage cannot propagate.
        row_ids = t * tile_rows + lax.broadcasted_iota(jnp.int32, (tn, 1), 0)
        ce_rows = jnp.where(row_ids < n_true, ce_rows, 0.0)

    acc_ref[...] += ce_rows                               # elementwise, no XLU reduce

    @pl.when(t == pl.num_programs(0) - 1)
    def _():
        out_ref[...] = jnp.sum(acc_ref[...], keepdims=True)   # single (1,1) reduce


def focal_loss(logits, target, *, max_rows_per_tile=None):
    """logits: (N, C) float (f32 or bf16), target: (N,) int class ids -> scalar f32."""
    n, c = logits.shape
    itemsize = jnp.dtype(logits.dtype).itemsize
    sublane = max(8, 32 // itemsize)          # 8 for f32, 16 for bf16

    budget, vmem_limit = _vmem_budgets()
    bytes_per_row = c * (2 * itemsize + _N_F32_TEMPS * 4) + _ACC_BYTES_PER_ROW
    tn = _round_down(budget // bytes_per_row, sublane)
    tn = max(sublane, tn)
    if max_rows_per_tile is not None:
        tn = max(sublane, min(tn, _round_down(max_rows_per_tile, sublane)))
    if tn >= n:
        tn = n          # single full-batch tile; full-dim blocks are (8,128)-exempt

    num_tiles = -(-n // tn)
    has_row_tail = (n % tn) != 0

    tgt = target.astype(jnp.int32).reshape(n, 1)

    kernel = functools.partial(_partial_ce_kernel, n_true=n, tile_rows=tn,
                               has_row_tail=has_row_tail)

    cost = pl.CostEstimate(
        flops=6 * n * c,
        transcendentals=n * c + n,
        bytes_accessed=n * c * itemsize + n * 4 + 4,
    )

    ce_sum = pl.pallas_call(
        kernel,
        out_shape=jax.ShapeDtypeStruct((1, 1), jnp.float32),
        grid=(num_tiles,),
        in_specs=[
            pl.BlockSpec((tn, c), lambda t: (t, 0)),
            pl.BlockSpec((tn, 1), lambda t: (t, 0)),
        ],
        out_specs=pl.BlockSpec((1, 1), lambda t: (0, 0)),
        scratch_shapes=[pltpu.VMEM((tn, 1), jnp.float32)],
        compiler_params=pltpu.CompilerParams(
            dimension_semantics=("arbitrary",),
            vmem_limit_bytes=vmem_limit,
        ),
        cost_estimate=cost,
    )(logits, tgt)

    # Mean + focal epilogue (a handful of scalar ops) in the wrapper.
    ce = ce_sum[0, 0] / jnp.float32(n)
    logpt = -ce
    pt = jnp.exp(logpt)
    focal = -((1.0 - pt) ** FOCUSING_PARAM) * logpt
    return BALANCE_PARAM * focal


def focal_loss_ref(logits, target):
    """Pure-JAX reference matching F.cross_entropy (mean) + focal epilogue."""
    lse = jax.nn.logsumexp(logits.astype(jnp.float32), axis=-1)
    tgt_logit = jnp.take_along_axis(logits.astype(jnp.float32),
                                    target[:, None], axis=-1)[:, 0]
    ce = jnp.mean(lse - tgt_logit)
    logpt = -ce
    pt = jnp.exp(logpt)
    return BALANCE_PARAM * (-((1.0 - pt) ** FOCUSING_PARAM) * logpt)


if __name__ == "__main__":
    key = jax.random.PRNGKey(0)
    k1, k2, k3, k4 = jax.random.split(key, 4)

    # 1) Small shape consistent with the module's classification use.
    N, C = 8, 32
    logits = jax.random.normal(k1, (N, C), dtype=jnp.float32)
    target = jax.random.randint(k2, (N,), 0, C, dtype=jnp.int32)
    out = jax.block_until_ready(focal_loss(logits, target))
    ref = focal_loss_ref(logits, target)
    assert jnp.allclose(out, ref, rtol=1e-5, atol=1e-5), (out, ref)

    # 2) Ragged shapes + forced multi-tile accumulation (exercises the cdiv grid,
    #    the ragged-row mask, the ragged class dim (200), and the vector accumulator).
    N2, C2 = 37, 200
    logits2 = jax.random.normal(k3, (N2, C2), dtype=jnp.float32)
    target2 = jax.random.randint(k4, (N2,), 0, C2, dtype=jnp.int32)
    out2 = jax.block_until_ready(focal_loss(logits2, target2, max_rows_per_tile=8))
    ref2 = focal_loss_ref(logits2, target2)
    assert jnp.allclose(out2, ref2, rtol=1e-5, atol=1e-5), (out2, ref2)

    # 3) bf16 ingestion (f32 logsumexp math in-kernel; exact bf16 target gather).
    out3 = jax.block_until_ready(
        focal_loss(logits2.astype(jnp.bfloat16), target2, max_rows_per_tile=16))
    ref3 = focal_loss_ref(logits2.astype(jnp.bfloat16), target2)
    assert jnp.allclose(out3, ref3, rtol=1e-4, atol=1e-4), (out3, ref3)

    print("KERNEL_OK")
</pallas_src>

<mosaic_0001>
module attributes {stable_mosaic.version = 11 : i64} {
  func.func @_partial_ce_kernel(%arg0: i32, %arg1: memref<8x32xf32, #tpu.memory_space<vmem>>, %arg2: memref<8x1xi32, #tpu.memory_space<vmem>>, %arg3: memref<1x1xf32, #tpu.memory_space<vmem>>, %arg4: memref<8x1xf32, #tpu.memory_space<vmem>>) attributes {dimension_semantics = [#tpu.dimension_semantics<arbitrary>], iteration_bounds = array<i64: 1>, scalar_prefetch = 0 : i64, scratch_operands = 1 : i64, tpu.core_type = #tpu.core_type<tc>, window_params = [{transform_indices = @transform_0, window_bounds = array<i64: 8, 32>}, {transform_indices = @transform_1, window_bounds = array<i64: 8, 1>}, {pipeline_mode = #tpu.pipeline_mode<synchronous>, transform_indices = @transform_2, window_bounds = array<i64: 1, 1>}]} {
    %c0_i32 = arith.constant 0 : i32
    %0 = arith.cmpi eq, %arg0, %c0_i32 : i32
    %1 = arith.extui %0 : i1 to i32
    %c0_i32_0 = arith.constant 0 : i32
    %2 = arith.cmpi ne, %1, %c0_i32_0 : i32
    scf.if %2 {
      %cst_13 = arith.constant 0.000000e+00 : f32
      %28 = vector.broadcast %cst_13 : f32 to vector<8x1xf32>
      %c0_14 = arith.constant 0 : index
      %c0_15 = arith.constant 0 : index
      %29 = vector.load %arg4[%c0_14, %c0_15] : memref<8x1xf32, #tpu.memory_space<vmem>>, vector<8x1xf32>
      tpu.vector_store %arg4[%c0_14, %c0_15], %28 {strides = array<i32>} : memref<8x1xf32, #tpu.memory_space<vmem>>, vector<8x1xf32>,
    } else {
    }
    %c0 = arith.constant 0 : index
    %c0_1 = arith.constant 0 : index
    %3 = vector.load %arg1[%c0, %c0_1] : memref<8x32xf32, #tpu.memory_space<vmem>>, vector<8x32xf32>
    %c0_2 = arith.constant 0 : index
    %c0_3 = arith.constant 0 : index
    %4 = vector.load %arg2[%c0_2, %c0_3] : memref<8x1xi32, #tpu.memory_space<vmem>>, vector<8x1xi32>
    %cst = arith.constant dense<0xFF800000> : vector<8xf32>
    %5 = vector.multi_reduction <maximumf>, %3, %cst [1] : vector<8x32xf32> to vector<8xf32>
    %6 = vector.shape_cast %5 : vector<8xf32> to vector<8x1xf32>
    %7 = vector.broadcast %6 : vector<8x1xf32> to vector<8x32xf32>
    %8 = arith.subf %3, %7 : vector<8x32xf32>
    %9 = math.exp %8 : vector<8x32xf32>
    %cst_4 = arith.constant dense<0.000000e+00> : vector<8xf32>
    %10 = vector.multi_reduction <add>, %9, %cst_4 [1] : vector<8x32xf32> to vector<8xf32>
    %11 = vector.shape_cast %10 : vector<8xf32> to vector<8x1xf32>
    %12 = math.log %11 : vector<8x1xf32>
    %13 = arith.addf %6, %12 : vector<8x1xf32>
    %14 = tpu.iota {dimensions = array<i32: 1>} : vector<8x32xi32>
    %15 = vector.broadcast %4 : vector<8x1xi32> to vector<8x32xi32>
    %16 = arith.cmpi eq, %14, %15 : vector<8x32xi32>
    %cst_5 = arith.constant 0.000000e+00 : f32
    %17 = vector.broadcast %cst_5 : f32 to vector<8x32xf32>
    %18 = arith.select %16, %3, %17 : vector<8x32xi1>, vector<8x32xf32>
    %cst_6 = arith.constant dense<0.000000e+00> : vector<8xf32>
    %19 = vector.multi_reduction <add>, %18, %cst_6 [1] : vector<8x32xf32> to vector<8xf32>
    %20 = vector.shape_cast %19 : vector<8xf32> to vector<8x1xf32>
    %21 = arith.subf %13, %20 : vector<8x1xf32>
    %c0_7 = arith.constant 0 : index
    %c0_8 = arith.constant 0 : index
    %22 = vector.load %arg4[%c0_7, %c0_8] : memref<8x1xf32, #tpu.memory_space<vmem>>, vector<8x1xf32>
    %23 = arith.addf %22, %21 : vector<8x1xf32>
    %c0_9 = arith.constant 0 : index
    %c0_10 = arith.constant 0 : index
    %24 = vector.load %arg4[%c0_9, %c0_10] : memref<8x1xf32, #tpu.memory_space<vmem>>, vector<8x1xf32>
    tpu.vector_store %arg4[%c0_9, %c0_10], %23 {strides = array<i32>} : memref<8x1xf32, #tpu.memory_space<vmem>>, vector<8x1xf32>,
    %c0_i32_11 = arith.constant 0 : i32
    %25 = arith.cmpi eq, %arg0, %c0_i32_11 : i32
    %26 = arith.extui %25 : i1 to i32
    %c0_i32_12 = arith.constant 0 : i32
    %27 = arith.cmpi ne, %26, %c0_i32_12 : i32
    scf.if %27 {
      %c0_13 = arith.constant 0 : index
      %c0_14 = arith.constant 0 : index
      %28 = vector.load %arg4[%c0_13, %c0_14] : memref<8x1xf32, #tpu.memory_space<vmem>>, vector<8x1xf32>
      %29 = vector.shape_cast %28 : vector<8x1xf32> to vector<1x8x1xf32>
      %cst_15 = arith.constant dense<0.000000e+00> : vector<1xf32>
      %30 = vector.multi_reduction <add>, %29, %cst_15 [1, 2] : vector<1x8x1xf32> to vector<1xf32>
      %31 = vector.shape_cast %30 : vector<1xf32> to vector<1x1x1xf32>
      %32 = vector.extract %31[0, 0, 0] : f32 from vector<1x1x1xf32>
      %33 = vector.broadcast %32 : f32 to vector<1x1xf32>
      %c0_16 = arith.constant 0 : index
      %c0_17 = arith.constant 0 : index
      %34 = vector.load %arg3[%c0_16, %c0_17] : memref<1x1xf32, #tpu.memory_space<vmem>>, vector<1x1xf32>
      tpu.vector_store %arg3[%c0_16, %c0_17], %33 {strides = array<i32>} : memref<1x1xf32, #tpu.memory_space<vmem>>, vector<1x1xf32>,
    } else {
    }
    return
  }
  func.func @transform_0(%arg0: i32) -> (i32, i32) {
    %c0_i32 = arith.constant 0 : i32
    %c0_i32_0 = arith.constant 0 : i32
    return %arg0, %c0_i32 : i32, i32
  }
  func.func @transform_1(%arg0: i32) -> (i32, i32) {
    %c0_i32 = arith.constant 0 : i32
    %c0_i32_0 = arith.constant 0 : i32
    return %arg0, %c0_i32 : i32, i32
  }
  func.func @transform_2(%arg0: i32) -> (i32, i32) {
    %c0_i32 = arith.constant 0 : i32
    %c0_i32_0 = arith.constant 0 : i32
    %c0_i32_1 = arith.constant 0 : i32
    return %c0_i32, %c0_i32_0 : i32, i32
  }
}

</mosaic_0001>

<bundles_post_ra>
// kernel: tpu_custom_call.1
= control target key start
LH: loop header
LB: loop body
LE: loop exit
PB: predicated region body
PF: predicated region fallthrough
CT: control target
= control target key end

     0   :  { %vm20_vm0 = vcmask 261120   ;;  %s147_s0 = inlined_call_operand.vmem [shape: f32[8,32], index: 0, kind: input, shape index: {}]   ;;  %s148_s1 = inlined_call_operand.vmem [shape: s32[8,1], index: 1, kind: input, shape index: {}]   ;;  %s149_s2 = inlined_call_operand.hbm [shape: f32[1,1], index: 2, kind: output, shape index: {}]  }
   0x1   :  { %v18_v0 = vld [vmem:[%s147_s0] sm:$0xff] }
   0x2   :  { %7 = vsyncpa [#allocation4], 0  ;;  %v21_v1 = vsel %vm20_vm0, %v18_v0, -inf  ;;  %v117_v2 = vmov 0   ;;  %v19_v3 = vld [vmem:[%s148_s1] sm:$0xff]  ;;  %v33_v9 = vlaneseq  ;;  %vm16_vm2 = vcmask 7168  }
   0x3   :  { %86 = vset.pattern.permute.xlu0 %v117_v2  ;;  %v118_v14 = vmov 0.0   ;;  %s119_s0 = smov [#allocation3]   ;;  %s72_s15 = sshll.u32 %s149_s2, 4  ;;  %vm63_vm3 = vcmask 0   ;;  %s73_s15 = int_to_ptr.hbm [resolvable:$true] %s72_s15 }
   0x4   :  { %22 = vmax.xlane.f32.xlu0 %v21_v1  ;;  %v34_v10 = vand.u32 127, %v33_v9  ;;  %17 = vst.msk [vmem:[#allocation2] sm:$0xff] %vm16_vm2, %v118_v14  ;;  %s70_s1 = sshll.u32 %s119_s0, 4  ;;  %s71_s1 = int_to_ptr.vmem [resolvable:$true] %s70_s1 }
   0xb   :  { %v44_v20 = vld [vmem:[#allocation2] sm:$0xff] }
  0x18   :  { %36 = vperm.xlu0 %86, %v19_v3  }
  0x77   :  { %v23_v4 = vpop.xlane.xlu0 %22 }
  0x78   :  { %v24_v5 = vsub.f32 %v18_v0, %v23_v4 }
  0x7a   :  { %v25_v6 = vmul.f32 1.442695, %v24_v5 }
  0x7c   :  { %87 = vpow2.f32 %v25_v6 }
  0x82   :  { %v88_v7 = vpop.eup %87 }
  0x83   :  { %v27_v8 = vsel %vm20_vm0, %v88_v7, 0.0 }
  0x84   :  { %28 = vadd.xlane.f32.xlu1 %v27_v8 }
  0x8a   :  { %v37_v11 = vpop.permute.xlu0 %36 }
  0x8b   :  { %vm38_vm1 = vcmp.eq.s32.totalorder %v34_v10, %v37_v11 }
  0x8c   :  { %v39_v12 = vsel %vm38_vm1, %v18_v0, 0.0 }
  0x8d   :  { %v40_v13 = vsel %vm20_vm0, %v39_v12, 0.0 }
  0x8e   :  { %41 = vadd.xlane.f32.xlu1 %v40_v13 }
  0xf7   :  { %v29_v15 = vpop.xlane.xlu1 %28 }
  0xf8   :  { %89 = vlog2.f32 %v29_v15 }
  0xfe   :  { %v90_v16 = vpop.eup %89 }
  0xff   :  { %v31_v17 = vmul.f32 0.6931472, %v90_v16 }
 0x101   :  { %v32_v18 = vadd.f32 %v31_v17, %v23_v4  ;;  %v42_v19 = vpop.xlane.xlu1 %41 }
 0x103   :  { %v43_v21 = vsub.f32 %v32_v18, %v42_v19 }
 0x105   :  { %v45_v22 = vadd.f32 %v44_v20, %v43_v21 }
 0x107   :  { %47 = vst.msk [vmem:[#allocation2] sm:$0xff] %vm16_vm2, %v45_v22 }
 0x10e   :  { %v51_v23 = vld [vmem:[#allocation2] sm:$0xff] }
 0x10f   :  { %v52_v24 = vsel %vm16_vm2, %v51_v23, 0.0 }
 0x110   :  { %53 = vadd.xlane.f32.xlu2 %v52_v24 }
 0x183   :  { %v54_v25 = vpop.xlane.xlu2 %53 }
 0x184   :  { %v55_v26 = vrot.slane %v54_v25, 4 }
 0x186   :  { %v56_v27 = vadd.f32 %v55_v26, %v54_v25 }
 0x188   :  { %v57_v28 = vrot.slane %v56_v27, 2 }
 0x18a   :  { %v58_v29 = vadd.f32 %v57_v28, %v56_v27 }
 0x18c   :  { %v59_v30 = vrot.slane %v58_v29, 1 }
 0x18e   :  { %v60_v31 = vadd.f32 %v59_v30, %v58_v29 }
 0x190   :  { %81 = vpush %v60_v31 }
 0x1c1   :  { %s82_s16 = spop %81 }
 0x1c2   :  { %v62_v32 = vstv %s82_s16 }
 0x1c3   :  { %64 = vst.msk [vmem:[#allocation3] sm:$0x1] %vm63_vm3, %v62_v32 }
 0x1c4   :  { %75 = dma.vmem_to_hbm [thread:$0]  %s71_s1, 16, %s73_s15, [#allocation4]  }
 0x1c5   :  { %115 = dma.done.wait [#allocation4], 16  }
 0x1c6   :  { %116 = vsyncadd [#allocation4], 4294967280 }
 0x1c7   :  { %80 = vsyncpa [#allocation4], 1 }

</bundles_post_ra>
